<compile_context>
chip_gen: v7x
topology: tpu7x:2x2x1
jax: 0.10.0
libtpu: 0.0.40
codegen_flags: <defaults>
</compile_context>

<pallas_src>
import jax
import jax.numpy as jnp
from jax.experimental import pallas as pl
from jax.experimental.pallas import tpu as pltpu

K_IN = 784
K_PAD = 896      # 7 * 128
H1 = 256
H2 = 128
N_OUT = 10
OUT_PAD = 128    # lane-dense output stores


def _round_up(n, m):
    return ((n + m - 1) // m) * m


def _fashion_dnn_kernel(x_ref, w1_ref, b1_ref, w2_ref, b2_ref, w3_ref, b3_ref, o_ref):
    # fc1 + ReLU  (bf16 operands, f32 MXU accumulation)
    h1 = jnp.dot(x_ref[...], w1_ref[...], preferred_element_type=jnp.float32)
    h1 = jnp.maximum(h1 + b1_ref[...], 0.0)
    # dropout(p=0.25) is identity in eval/inference mode.
    # TODO(synk): training-mode dropout (random mask + 1/(1-p) scale) not implemented.
    # fc2 + ReLU
    h2 = jnp.dot(h1.astype(jnp.bfloat16), w2_ref[...], preferred_element_type=jnp.float32)
    h2 = jnp.maximum(h2 + b2_ref[...], 0.0)
    # fc3 (logits; output columns 10..127 are zero padding)
    out = jnp.dot(h2.astype(jnp.bfloat16), w3_ref[...], preferred_element_type=jnp.float32)
    o_ref[...] = (out + b3_ref[...]).astype(o_ref.dtype)


def prepare_params(params):
    """One-time conversion of PyTorch-layout params (W: (out,in), b: (out,)) to
    kernel layout: transposed to (in,out), zero-padded to 128-multiples,
    weights cast to bf16, biases kept f32 as (1, out) rows."""
    w1, b1, w2, b2, w3, b3 = params
    w1t = jnp.zeros((K_PAD, H1), jnp.bfloat16).at[:K_IN, :].set(w1.T.astype(jnp.bfloat16))
    w2t = w2.T.astype(jnp.bfloat16)  # (256, 128)
    w3t = jnp.zeros((H2, OUT_PAD), jnp.bfloat16).at[:, :N_OUT].set(w3.T.astype(jnp.bfloat16))
    b1r = b1.reshape(1, H1).astype(jnp.float32)
    b2r = b2.reshape(1, H2).astype(jnp.float32)
    b3r = jnp.zeros((1, OUT_PAD), jnp.float32).at[:, :N_OUT].set(b3.astype(jnp.float32))
    return (w1t, b1r, w2t, b2r, w3t, b3r)


def fashion_dnn_forward(x, prepared):
    """x: (B, 1, 28, 28) or (B, 784). Returns (B, 10) float32 logits."""
    w1t, b1r, w2t, b2r, w3t, b3r = prepared
    x2d = x.reshape(-1, K_IN)
    B = x2d.shape[0]

    # Batch tile: fill the MXU M dimension when possible; multiple of 16 for
    # bf16 sublane packing when B is small.
    TB = 256 if B >= 256 else _round_up(B, 16)
    B_pad = _round_up(B, TB)

    # Zero-pad batch and K dims; cast the activation stream to bf16.
    xp = jnp.zeros((B_pad, K_PAD), jnp.bfloat16)
    xp = xp.at[:B, :K_IN].set(x2d.astype(jnp.bfloat16))

    grid = (B_pad // TB,)
    resident = lambda shape: pl.BlockSpec(shape, lambda i: (0,) * len(shape))

    out = pl.pallas_call(
        _fashion_dnn_kernel,
        out_shape=jax.ShapeDtypeStruct((B_pad, OUT_PAD), jnp.float32),
        grid=grid,
        in_specs=[
            pl.BlockSpec((TB, K_PAD), lambda i: (i, 0)),   # x tile, pipelined over batch
            resident((K_PAD, H1)), resident((1, H1)),       # fc1 weights/bias (VMEM-resident)
            resident((H1, H2)), resident((1, H2)),          # fc2
            resident((H2, OUT_PAD)), resident((1, OUT_PAD)),  # fc3 (padded to 128 lanes)
        ],
        out_specs=pl.BlockSpec((TB, OUT_PAD), lambda i: (i, 0)),
        compiler_params=pltpu.CompilerParams(
            dimension_semantics=("parallel",)),
    )(xp, w1t, b1r, w2t, b2r, w3t, b3r)

    return out[:B, :N_OUT]


def init_params(key):
    """Deterministic init matching nn.Linear shapes: W (out, in), b (out,)."""
    ks = jax.random.split(key, 6)

    def uniform_linear(kw, kb, out_f, in_f):
        bound = 1.0 / jnp.sqrt(jnp.float32(in_f))
        w = jax.random.uniform(kw, (out_f, in_f), jnp.float32, -bound, bound)
        b = jax.random.uniform(kb, (out_f,), jnp.float32, -bound, bound)
        return w, b

    w1, b1 = uniform_linear(ks[0], ks[1], H1, K_IN)
    w2, b2 = uniform_linear(ks[2], ks[3], H2, H1)
    w3, b3 = uniform_linear(ks[4], ks[5], N_OUT, H2)
    return (w1, b1, w2, b2, w3, b3)


def reference_forward_bf16(x, params):
    """Pure-JAX reference with the same bf16-operand / f32-accumulate recipe."""
    w1, b1, w2, b2, w3, b3 = params
    h = x.reshape(-1, K_IN).astype(jnp.bfloat16)
    h = jnp.dot(h, w1.T.astype(jnp.bfloat16), preferred_element_type=jnp.float32) + b1
    h = jnp.maximum(h, 0.0)
    h = jnp.dot(h.astype(jnp.bfloat16), w2.T.astype(jnp.bfloat16),
                preferred_element_type=jnp.float32) + b2
    h = jnp.maximum(h, 0.0)
    return jnp.dot(h.astype(jnp.bfloat16), w3.T.astype(jnp.bfloat16),
                   preferred_element_type=jnp.float32) + b3


if __name__ == "__main__":
    key = jax.random.PRNGKey(0)
    k_x, k_p = jax.random.split(key)

    # NCHW Fashion-MNIST-like input: batch=8, 1 channel, 28x28.
    x = jax.random.normal(k_x, (8, 1, 28, 28), jnp.float32)
    params = init_params(k_p)
    prepared = prepare_params(params)

    out = fashion_dnn_forward(x, prepared)
    out = jax.block_until_ready(out)

    ref = reference_forward_bf16(x, params)
    assert out.shape == (8, N_OUT)
    assert jnp.allclose(out, ref, atol=2e-2, rtol=2e-2)

    print("KERNEL_OK")
</pallas_src>

<mosaic_0001>
module attributes {stable_mosaic.version = 11 : i64} {
  func.func @_fashion_dnn_kernel(%arg0: i32, %arg1: memref<16x896xbf16, #tpu.memory_space<vmem>>, %arg2: memref<896x256xbf16, #tpu.memory_space<vmem>>, %arg3: memref<1x256xf32, #tpu.memory_space<vmem>>, %arg4: memref<256x128xbf16, #tpu.memory_space<vmem>>, %arg5: memref<1x128xf32, #tpu.memory_space<vmem>>, %arg6: memref<128x128xbf16, #tpu.memory_space<vmem>>, %arg7: memref<1x128xf32, #tpu.memory_space<vmem>>, %arg8: memref<16x128xf32, #tpu.memory_space<vmem>>) attributes {dimension_semantics = [#tpu.dimension_semantics<parallel>], iteration_bounds = array<i64: 1>, scalar_prefetch = 0 : i64, scratch_operands = 0 : i64, tpu.core_type = #tpu.core_type<tc>, window_params = [{transform_indices = @transform_0, window_bounds = array<i64: 16, 896>}, {pipeline_mode = #tpu.pipeline_mode<synchronous>, transform_indices = @transform_1, window_bounds = array<i64: 896, 256>}, {pipeline_mode = #tpu.pipeline_mode<synchronous>, transform_indices = @transform_2, window_bounds = array<i64: 1, 256>}, {pipeline_mode = #tpu.pipeline_mode<synchronous>, transform_indices = @transform_3, window_bounds = array<i64: 256, 128>}, {pipeline_mode = #tpu.pipeline_mode<synchronous>, transform_indices = @transform_4, window_bounds = array<i64: 1, 128>}, {pipeline_mode = #tpu.pipeline_mode<synchronous>, transform_indices = @transform_5, window_bounds = array<i64: 128, 128>}, {pipeline_mode = #tpu.pipeline_mode<synchronous>, transform_indices = @transform_6, window_bounds = array<i64: 1, 128>}, {transform_indices = @transform_7, window_bounds = array<i64: 16, 128>}]} {
    %c0 = arith.constant 0 : index
    %c0_0 = arith.constant 0 : index
    %0 = vector.load %arg1[%c0, %c0_0] : memref<16x896xbf16, #tpu.memory_space<vmem>>, vector<16x896xbf16>
    %c0_1 = arith.constant 0 : index
    %c0_2 = arith.constant 0 : index
    %1 = vector.load %arg2[%c0_1, %c0_2] : memref<896x256xbf16, #tpu.memory_space<vmem>>, vector<896x256xbf16>
    %cst = arith.constant dense<0.000000e+00> : vector<16x256xf32>
    %2 = tpu.matmul %0, %1, %cst {dimension_numbers = #tpu.dot_dimension_numbers<[1], [0], [0], [1], [0, 0, 1, 1], [], []>} : vector<16x896xbf16>, vector<896x256xbf16>, vector<16x256xf32> -> vector<16x256xf32>
    %c0_3 = arith.constant 0 : index
    %c0_4 = arith.constant 0 : index
    %3 = vector.load %arg3[%c0_3, %c0_4] : memref<1x256xf32, #tpu.memory_space<vmem>>, vector<1x256xf32>
    %4 = vector.broadcast %3 : vector<1x256xf32> to vector<16x256xf32>
    %5 = arith.addf %2, %4 : vector<16x256xf32>
    %cst_5 = arith.constant 0.000000e+00 : f32
    %6 = vector.broadcast %cst_5 : f32 to vector<16x256xf32>
    %7 = arith.maximumf %5, %6 : vector<16x256xf32>
    %8 = arith.truncf %7 : vector<16x256xf32> to vector<16x256xbf16>
    %c0_6 = arith.constant 0 : index
    %c0_7 = arith.constant 0 : index
    %9 = vector.load %arg4[%c0_6, %c0_7] : memref<256x128xbf16, #tpu.memory_space<vmem>>, vector<256x128xbf16>
    %cst_8 = arith.constant dense<0.000000e+00> : vector<16x128xf32>
    %10 = tpu.matmul %8, %9, %cst_8 {dimension_numbers = #tpu.dot_dimension_numbers<[1], [0], [0], [1], [0, 0, 1, 1], [], []>} : vector<16x256xbf16>, vector<256x128xbf16>, vector<16x128xf32> -> vector<16x128xf32>
    %c0_9 = arith.constant 0 : index
    %c0_10 = arith.constant 0 : index
    %11 = vector.load %arg5[%c0_9, %c0_10] : memref<1x128xf32, #tpu.memory_space<vmem>>, vector<1x128xf32>
    %12 = vector.broadcast %11 : vector<1x128xf32> to vector<16x128xf32>
    %13 = arith.addf %10, %12 : vector<16x128xf32>
    %cst_11 = arith.constant 0.000000e+00 : f32
    %14 = vector.broadcast %cst_11 : f32 to vector<16x128xf32>
    %15 = arith.maximumf %13, %14 : vector<16x128xf32>
    %16 = arith.truncf %15 : vector<16x128xf32> to vector<16x128xbf16>
    %c0_12 = arith.constant 0 : index
    %c0_13 = arith.constant 0 : index
    %17 = vector.load %arg6[%c0_12, %c0_13] : memref<128x128xbf16, #tpu.memory_space<vmem>>, vector<128x128xbf16>
    %cst_14 = arith.constant dense<0.000000e+00> : vector<16x128xf32>
    %18 = tpu.matmul %16, %17, %cst_14 {dimension_numbers = #tpu.dot_dimension_numbers<[1], [0], [0], [1], [0, 0, 1, 1], [], []>} : vector<16x128xbf16>, vector<128x128xbf16>, vector<16x128xf32> -> vector<16x128xf32>
    %c0_15 = arith.constant 0 : index
    %c0_16 = arith.constant 0 : index
    %19 = vector.load %arg7[%c0_15, %c0_16] : memref<1x128xf32, #tpu.memory_space<vmem>>, vector<1x128xf32>
    %20 = vector.broadcast %19 : vector<1x128xf32> to vector<16x128xf32>
    %21 = arith.addf %18, %20 : vector<16x128xf32>
    %c0_17 = arith.constant 0 : index
    %c0_18 = arith.constant 0 : index
    %22 = vector.load %arg8[%c0_17, %c0_18] : memref<16x128xf32, #tpu.memory_space<vmem>>, vector<16x128xf32>
    tpu.vector_store %arg8[%c0_17, %c0_18], %21 {strides = array<i32>} : memref<16x128xf32, #tpu.memory_space<vmem>>, vector<16x128xf32>,
    return
  }
  func.func @transform_0(%arg0: i32) -> (i32, i32) {
    %c0_i32 = arith.constant 0 : i32
    %c0_i32_0 = arith.constant 0 : i32
    return %arg0, %c0_i32 : i32, i32
  }
  func.func @transform_1(%arg0: i32) -> (i32, i32) {
    %c0_i32 = arith.constant 0 : i32
    %c0_i32_0 = arith.constant 0 : i32
    %c0_i32_1 = arith.constant 0 : i32
    return %c0_i32, %c0_i32_0 : i32, i32
  }
  func.func @transform_2(%arg0: i32) -> (i32, i32) {
    %c0_i32 = arith.constant 0 : i32
    %c0_i32_0 = arith.constant 0 : i32
    %c0_i32_1 = arith.constant 0 : i32
    return %c0_i32, %c0_i32_0 : i32, i32
  }
  func.func @transform_3(%arg0: i32) -> (i32, i32) {
    %c0_i32 = arith.constant 0 : i32
    %c0_i32_0 = arith.constant 0 : i32
    %c0_i32_1 = arith.constant 0 : i32
    return %c0_i32, %c0_i32_0 : i32, i32
  }
  func.func @transform_4(%arg0: i32) -> (i32, i32) {
    %c0_i32 = arith.constant 0 : i32
    %c0_i32_0 = arith.constant 0 : i32
    %c0_i32_1 = arith.constant 0 : i32
    return %c0_i32, %c0_i32_0 : i32, i32
  }
  func.func @transform_5(%arg0: i32) -> (i32, i32) {
    %c0_i32 = arith.constant 0 : i32
    %c0_i32_0 = arith.constant 0 : i32
    %c0_i32_1 = arith.constant 0 : i32
    return %c0_i32, %c0_i32_0 : i32, i32
  }
  func.func @transform_6(%arg0: i32) -> (i32, i32) {
    %c0_i32 = arith.constant 0 : i32
    %c0_i32_0 = arith.constant 0 : i32
    %c0_i32_1 = arith.constant 0 : i32
    return %c0_i32, %c0_i32_0 : i32, i32
  }
  func.func @transform_7(%arg0: i32) -> (i32, i32) {
    %c0_i32 = arith.constant 0 : i32
    %c0_i32_0 = arith.constant 0 : i32
    return %arg0, %c0_i32 : i32, i32
  }
}

</mosaic_0001>

<bundles_post_ra>
// kernel: tpu_custom_call.1
= control target key start
LH: loop header
LB: loop body
LE: loop exit
PB: predicated region body
PF: predicated region fallthrough
CT: control target
= control target key end

     0   :  { %12 = vsyncpa [#allocation3], 0  ;;  %s1976_s0 = inlined_call_operand.hbm [shape: bf16[16,896], index: 0, kind: input, shape index: {}]   ;;  %s1977_s1 = inlined_call_operand.hbm [shape: bf16[896,256], index: 1, kind: input, shape index: {}]   ;;  %s1978_s2 = inlined_call_operand.vmem [shape: f32[1,256], index: 2, kind: input, shape index: {}]   ;;  %s1979_s3 = inlined_call_operand.hbm [shape: bf16[256,128], index: 3, kind: input, shape index: {}]   ;;  %s1980_s4 = inlined_call_operand.vmem [shape: f32[1,128], index: 4, kind: input, shape index: {}]   ;;  %s1981_s5 = inlined_call_operand.hbm [shape: bf16[128,128], index: 5, kind: input, shape index: {}]   ;;  %s1982_s6 = inlined_call_operand.vmem [shape: f32[1,128], index: 6, kind: input, shape index: {}]   ;;  %s1983_s7 = inlined_call_operand.hbm [shape: f32[16,128], index: 7, kind: output, shape index: {}]  }
   0x1   :  { %13 = vsyncpa [#allocation6], 0 }
   0x2   :  { %14 = vsyncpa [#allocation9], 0 }
   0x3   :  { %15 = vsyncpa [#allocation4], 0  ;;  %s1847_s24 = smov [#allocation5]   ;;  %s1729_s28 = scalar_lea.hbm %s1977_s1, 14336 }
   0x4   :  { %s33_s25 = sshll.u32 %s1847_s24, 4  ;;  %p1730_p0 = scmp.ne.s32.totalorder %s1977_s1, %s1729_s28  ;;  %s34_s25 = int_to_ptr.vmem [resolvable:$true] %s33_s25 }
   0x5   :  { %p1733_p1 = scmp.lt.u32.totalorder %s1729_s28, %s1977_s1 }
   0x7   :  { %p1735_p2 = pnand %p1733_p1, %p1730_p0 }
   0x9   :  { %1738 = shalt.err (!%p1735_p2)
}
   0xa   :  { %s1739_s10 = scalar_lea.vmem %s34_s25, 14336  ;;  %p1744_p4 = scmp.lt.s32.totalorder %s34_s25, %s34_s25 }
   0xb   :  { %p1740_p3 = scmp.ne.s32.totalorder %s34_s25, %s1739_s10  ;;  %p1745_p5 = scmp.lt.s32.totalorder %s1739_s10, %s1739_s10 }
   0xd   :  { %p1746_p6 = por %p1745_p5, %p1744_p4 }
   0xf   :  { %p1747_p7 = pnand %p1746_p6, %p1740_p3 }
  0x11   :  { %1750 = shalt.err (!%p1747_p7)
}
  0x12   :  { %s1848_s11 = smov 128   ;;  %s1849_s12 = smov 8  }
  0x13   :  { %39 = dma.hbm_to_vmem [thread:$0]  %s1977_s1, 14336, %s34_s25, [#allocation6], %s1848_s11, %s1848_s11, %s1849_s12  }
  0x14   :  { %s1850_s15 = smov [#allocation2]   ;;  %s1751_s19 = scalar_lea.hbm %s1976_s0, 896 }
  0x15   :  { %s21_s16 = sshll.u32 %s1850_s15, 4  ;;  %p1752_p8 = scmp.ne.s32.totalorder %s1976_s0, %s1751_s19  ;;  %s22_s16 = int_to_ptr.vmem [resolvable:$true] %s21_s16 }
  0x16   :  { %p1755_p9 = scmp.lt.u32.totalorder %s1751_s19, %s1976_s0 }
  0x18   :  { %p1757_p10 = pnand %p1755_p9, %p1752_p8 }
  0x1a   :  { %1760 = shalt.err (!%p1757_p10)
}
  0x1b   :  { %s1761_s24 = scalar_lea.vmem %s22_s16, 896  ;;  %p1766_p12 = scmp.lt.s32.totalorder %s22_s16, %s22_s16 }
  0x1c   :  { %p1762_p11 = scmp.ne.s32.totalorder %s22_s16, %s1761_s24  ;;  %p1767_p13 = scmp.lt.s32.totalorder %s1761_s24, %s1761_s24 }
  0x1e   :  { %p1768_p0 = por %p1767_p13, %p1766_p12 }
  0x20   :  { %p1769_p1 = pnand %p1768_p0, %p1762_p11 }
  0x22   :  { %1772 = shalt.err (!%p1769_p1)
}
  0x23   :  { %s1851_s1 = smov 448   ;;  %s1852_s25 = smov 28  }
  0x24   :  { %27 = dma.hbm_to_vmem [thread:$0]  %s1976_s0, 896, %s22_s16, [#allocation3], %s1851_s1, %s1851_s1, %s1852_s25  }
  0x25   :  { %s1853_s28 = smov [#allocation7]   ;;  %s1773_s9 = scalar_lea.hbm %s1979_s3, 2048 }
  0x26   :  { %s47_s29 = sshll.u32 %s1853_s28, 4  ;;  %p1774_p2 = scmp.ne.s32.totalorder %s1979_s3, %s1773_s9  ;;  %s48_s29 = int_to_ptr.vmem [resolvable:$true] %s47_s29 }
  0x27   :  { %p1777_p3 = scmp.lt.u32.totalorder %s1773_s9, %s1979_s3 }
  0x29   :  { %p1779_p4 = pnand %p1777_p3, %p1774_p2 }
  0x2b   :  { %1782 = shalt.err (!%p1779_p4)
}
  0x2c   :  { %s1783_s17 = scalar_lea.vmem %s48_s29, 2048  ;;  %p1788_p6 = scmp.lt.s32.totalorder %s48_s29, %s48_s29 }
  0x2d   :  { %p1784_p5 = scmp.ne.s32.totalorder %s48_s29, %s1783_s17  ;;  %p1789_p7 = scmp.lt.s32.totalorder %s1783_s17, %s1783_s17 }
  0x2f   :  { %p1790_p8 = por %p1789_p7, %p1788_p6 }
  0x31   :  { %p1791_p9 = pnand %p1790_p8, %p1784_p5 }
  0x33   :  { %1794 = shalt.err (!%p1791_p9)
}
  0x34   :  { %s1854_s0 = smov 64   ;;  %s1855_s16 = smov 4  }
  0x35   :  { %53 = dma.hbm_to_vmem [thread:$0]  %s1979_s3, 2048, %s48_s29, [#allocation6], %s1854_s0, %s1854_s0, %s1855_s16  }
  0x36   :  { %s1856_s20 = smov [#allocation8]   ;;  %s1795_s24 = scalar_lea.hbm %s1981_s5, 1024 }
  0x37   :  { %s61_s21 = sshll.u32 %s1856_s20, 4  ;;  %p1796_p10 = scmp.ne.s32.totalorder %s1981_s5, %s1795_s24  ;;  %s62_s21 = int_to_ptr.vmem [resolvable:$true] %s61_s21 }
  0x38   :  { %p1799_p11 = scmp.lt.u32.totalorder %s1795_s24, %s1981_s5 }
  0x3a   :  { %p1801_p12 = pnand %p1799_p11, %p1796_p10 }
  0x3c   :  { %1804 = shalt.err (!%p1801_p12)
}
  0x3d   :  { %s1805_s28 = scalar_lea.vmem %s62_s21, 1024  ;;  %p1810_p0 = scmp.lt.s32.totalorder %s62_s21, %s62_s21 }
  0x3e   :  { %p1806_p13 = scmp.ne.s32.totalorder %s62_s21, %s1805_s28  ;;  %p1811_p1 = scmp.lt.s32.totalorder %s1805_s28, %s1805_s28 }
  0x40   :  { %p1812_p2 = por %p1811_p1, %p1810_p0 }
  0x42   :  { %p1813_p3 = pnand %p1812_p2, %p1806_p13 }
  0x44   :  { %1816 = shalt.err (!%p1813_p3)
}
  0x45   :  { %67 = dma.hbm_to_vmem [thread:$0]  %s1981_s5, 1024, %s62_s21, [#allocation9], %s1854_s0, %s1854_s0, %s1855_s16  }
  0x46   :  { %1839 = dma.done.wait [#allocation3], 896  }
  0x47   :  { %1840 = vsyncadd [#allocation3], 4294966400 }
  0x48   :  { %1841 = dma.done.wait [#allocation6], 16384  }
  0x49   :  { %1842 = vsyncadd [#allocation6], 4294950912 }
  0x4a   :  { %1843 = dma.done.wait [#allocation9], 1024  }
  0x4b   :  { %1844 = vsyncadd [#allocation9], 4294966272  ;;  %v1527_v0 = vld [vmem:[#allocation5 + $0x104] ss:$8 sps:$4 sm:$0xff]   ;;  %v1529_v1 = vld [vmem:[#allocation5 + $0x100] ss:$8 sps:$4 sm:$0xff]  }
  0x4c   :  { %854 = vmatprep.subr.bf16.mxu0 %v1527_v0  ;;  %v1530_v2 = vld [vmem:[#allocation5 + $0x114] ss:$8 sps:$4 sm:$0xff]   ;;  %v1532_v3 = vld [vmem:[#allocation5 + $0x110] ss:$8 sps:$4 sm:$0xff]   ;;  %v1533_v4 = vld [vmem:[#allocation5 + $0x124] ss:$8 sps:$4 sm:$0xff]  }
  0x4d   :  { %855 = vmatpush1.bf16.msra.mxu0 %v1529_v1  ;;  %v1535_v5 = vld [vmem:[#allocation5 + $0x120] ss:$8 sps:$4 sm:$0xff]   ;;  %v1536_v6 = vld [vmem:[#allocation5 + $0x134] ss:$8 sps:$4 sm:$0xff]   ;;  %v1538_v7 = vld [vmem:[#allocation5 + $0x130] ss:$8 sps:$4 sm:$0xff]  }
  0x4e   :  { %856 = vmatprep.subr.bf16.mxu0 %v1530_v2  ;;  %v1539_v8 = vld [vmem:[#allocation5 + $0x144] ss:$8 sps:$4 sm:$0xff]   ;;  %v1541_v9 = vld [vmem:[#allocation5 + $0x140] ss:$8 sps:$4 sm:$0xff]   ;;  %v1542_v10 = vld [vmem:[#allocation5 + $0x154] ss:$8 sps:$4 sm:$0xff]  }
  0x4f   :  { %v1544_v11 = vld [vmem:[#allocation5 + $0x150] ss:$8 sps:$4 sm:$0xff]   ;;  %v1545_v12 = vld [vmem:[#allocation5 + $0x164] ss:$8 sps:$4 sm:$0xff]   ;;  %v1547_v14 = vld [vmem:[#allocation5 + $0x160] ss:$8 sps:$4 sm:$0xff]  }
  0x50   :  { %v1577_v13 = vld [vmem:[#allocation2 + $0xc] ss:$28 sps:$4 sm:$0xff]   ;;  %v1551_v17 = vld [vmem:[#allocation5 + $0x184] ss:$8 sps:$4 sm:$0xff]   ;;  %v1553_v18 = vld [vmem:[#allocation5 + $0x180] ss:$8 sps:$4 sm:$0xff]  }
  0x51   :  { %857 = vmatpush1.bf16.msra.mxu0 %v1532_v3  ;;  %v1548_v15 = vld [vmem:[#allocation5 + $0x174] ss:$8 sps:$4 sm:$0xff]   ;;  %886 = vmatprep.mubr.bf16.mxu0 %v1577_v13  ;;  %v1550_v16 = vld [vmem:[#allocation5 + $0x170] ss:$8 sps:$4 sm:$0xff]   ;;  %v1599_v20 = vld [vmem:[#allocation5 + $0x4] ss:$8 sps:$4 sm:$0xff]  }
  0x52   :  { %858 = vmatprep.subr.bf16.mxu0 %v1533_v4  ;;  %v1554_v19 = vld [vmem:[#allocation5 + $0x194] ss:$8 sps:$4 sm:$0xff]   ;;  %v1601_v21 = vld [vmem:[#allocation5] ss:$8 sps:$4 sm:$0xff]   ;;  %v1556_v22 = vld [vmem:[#allocation5 + $0x190] ss:$8 sps:$4 sm:$0xff]   ;;  %811 = vmatprep.subr.bf16.mxu1 %v1599_v20 }
  0x53   :  { %812 = vmatpush1.bf16.msra.mxu1 %v1601_v21  ;;  %v1605_v23 = vld [vmem:[#allocation5 + $0x14] ss:$8 sps:$4 sm:$0xff]   ;;  %v1607_v24 = vld [vmem:[#allocation5 + $0x10] ss:$8 sps:$4 sm:$0xff]   ;;  %v1557_v25 = vld [vmem:[#allocation5 + $0x1a4] ss:$8 sps:$4 sm:$0xff]  }
  0x54   :  { %813 = vmatprep.subr.bf16.mxu1 %v1605_v23  ;;  %v1559_v26 = vld [vmem:[#allocation5 + $0x1a0] ss:$8 sps:$4 sm:$0xff]   ;;  %v1611_v27 = vld [vmem:[#allocation5 + $0x24] ss:$8 sps:$4 sm:$0xff]   ;;  %v1560_v28 = vld [vmem:[#allocation5 + $0x1b4] ss:$8 sps:$4 sm:$0xff]  }
  0x55   :  { %859 = vmatpush1.bf16.msra.mxu0 %v1535_v5  ;;  %v1613_v29 = vld [vmem:[#allocation5 + $0x20] ss:$8 sps:$4 sm:$0xff]   ;;  %v1617_v30 = vld [vmem:[#allocation5 + $0x34] ss:$8 sps:$4 sm:$0xff]   ;;  %v1562_v31 = vld [vmem:[#allocation5 + $0x1b0] ss:$8 sps:$4 sm:$0xff]  }
  0x56   :  { %860 = vmatprep.subr.bf16.mxu0 %v1536_v6  ;;  %v1563_v32 = vld [vmem:[#allocation5 + $0x1c4] ss:$8 sps:$4 sm:$0xff]   ;;  %v1619_v33 = vld [vmem:[#allocation5 + $0x30] ss:$8 sps:$4 sm:$0xff]   ;;  %v1565_v35 = vld [vmem:[#allocation5 + $0x1c0] ss:$8 sps:$4 sm:$0xff]  }
  0x57   :  { %814 = vmatpush1.bf16.msra.mxu1 %v1607_v24  ;;  %v1623_v34 = vld [vmem:[#allocation5 + $0x44] ss:$8 sps:$4 sm:$0xff]   ;;  %v1566_v36 = vld [vmem:[#allocation5 + $0x1d4] ss:$8 sps:$4 sm:$0xff]   ;;  %v1625_v37 = vld [vmem:[#allocation5 + $0x40] ss:$8 sps:$4 sm:$0xff]  }
  0x58   :  { %815 = vmatprep.subr.bf16.mxu1 %v1611_v27  ;;  %v1629_v38 = vld [vmem:[#allocation5 + $0x54] ss:$8 sps:$4 sm:$0xff]   ;;  %v1568_v39 = vld [vmem:[#allocation5 + $0x1d0] ss:$8 sps:$4 sm:$0xff]   ;;  %v1569_v40 = vld [vmem:[#allocation5 + $0x1e4] ss:$8 sps:$4 sm:$0xff]  }
  0x59   :  { %861 = vmatpush1.bf16.msra.mxu0 %v1538_v7  ;;  %v1631_v41 = vld [vmem:[#allocation5 + $0x50] ss:$8 sps:$4 sm:$0xff]   ;;  %v1635_v42 = vld [vmem:[#allocation5 + $0x64] ss:$8 sps:$4 sm:$0xff]   ;;  %v1571_v43 = vld [vmem:[#allocation5 + $0x1e0] ss:$8 sps:$4 sm:$0xff]  }
  0x5a   :  { %862 = vmatprep.subr.bf16.mxu0 %v1539_v8  ;;  %v1572_v44 = vld [vmem:[#allocation5 + $0x1f4] ss:$8 sps:$4 sm:$0xff]   ;;  %v1637_v45 = vld [vmem:[#allocation5 + $0x60] ss:$8 sps:$4 sm:$0xff]   ;;  %v1574_v47 = vld [vmem:[#allocation5 + $0x1f0] ss:$8 sps:$4 sm:$0xff]  }
  0x5b   :  { %816 = vmatpush1.bf16.msra.mxu1 %v1613_v29  ;;  %v1641_v46 = vld [vmem:[#allocation5 + $0x74] ss:$8 sps:$4 sm:$0xff]   ;;  %v1580_v48 = vld [vmem:[#allocation5 + $0x204] ss:$8 sps:$4 sm:$0xff]   ;;  %v1643_v49 = vld [vmem:[#allocation5 + $0x70] ss:$8 sps:$4 sm:$0xff]  }
  0x5c   :  { %817 = vmatprep.subr.bf16.mxu1 %v1617_v30  ;;  %v1647_v50 = vld [vmem:[#allocation5 + $0x84] ss:$8 sps:$4 sm:$0xff]   ;;  %v1578_v52 = vld [vmem:[#allocation5 + $0x200] ss:$8 sps:$4 sm:$0xff]   ;;  %v1583_v53 = vld [vmem:[#allocation5 + $0x214] ss:$8 sps:$4 sm:$0xff]  }
  0x5d   :  { %863 = vmatpush1.bf16.msra.mxu0 %v1541_v9  ;;  %v1575_v51 = vld [vmem:[#allocation2 + $0x8] ss:$28 sps:$4 sm:$0xff]   ;;  %v1649_v54 = vld [vmem:[#allocation5 + $0x80] ss:$8 sps:$4 sm:$0xff]   ;;  %v1653_v55 = vld [vmem:[#allocation5 + $0x94] ss:$8 sps:$4 sm:$0xff]  }
  0x5e   :  { %864 = vmatprep.subr.bf16.mxu0 %v1542_v10  ;;  %v1658_v56 = vld [vmem:[#allocation2 + $0x14] ss:$28 sps:$4 sm:$0xff]   ;;  %v1586_v58 = vld [vmem:[#allocation5 + $0x224] ss:$8 sps:$4 sm:$0xff]   ;;  %v1584_v61 = vld [vmem:[#allocation5 + $0x220] ss:$8 sps:$4 sm:$0xff]  }
  0x5f   :  { %818 = vmatpush1.bf16.msra.mxu1 %v1619_v33  ;;  %v1581_v57 = vld [vmem:[#allocation5 + $0x210] ss:$8 sps:$4 sm:$0xff]   ;;  %v1662_v60 = vld [vmem:[#allocation5 + $0xa4] ss:$8 sps:$4 sm:$0xff]   ;;  %v1589_v62 = vld [vmem:[#allocation5 + $0x234] ss:$8 sps:$4 sm:$0xff]  }
  0x60   :  { %819 = vmatprep.subr.bf16.mxu1 %v1623_v34  ;;  %v1655_v59 = vld [vmem:[#allocation5 + $0x90] ss:$8 sps:$4 sm:$0xff]   ;;  %v1664_v63 = vld [vmem:[#allocation5 + $0xa0] ss:$8 sps:$4 sm:$0xff]   ;;  %v1668_v0 = vld [vmem:[#allocation5 + $0xb4] ss:$8 sps:$4 sm:$0xff]  }
  0x61   :  { %865 = vmatpush1.bf16.msra.mxu0 %v1544_v11  ;;  %v1587_v1 = vld [vmem:[#allocation5 + $0x230] ss:$8 sps:$4 sm:$0xff]   ;;  %v1592_v2 = vld [vmem:[#allocation5 + $0x244] ss:$8 sps:$4 sm:$0xff]   ;;  %v1590_v6 = vld [vmem:[#allocation5 + $0x240] ss:$8 sps:$4 sm:$0xff]  }
  0x62   :  { %866 = vmatprep.subr.bf16.mxu0 %v1545_v12  ;;  %v1670_v3 = vld [vmem:[#allocation5 + $0xb0] ss:$8 sps:$4 sm:$0xff]   ;;  %v1674_v4 = vld [vmem:[#allocation5 + $0xc4] ss:$8 sps:$4 sm:$0xff]   ;;  %v1595_v7 = vld [vmem:[#allocation5 + $0x254] ss:$8 sps:$4 sm:$0xff]  }
  0x63   :  { %820 = vmatpush1.bf16.msra.mxu1 %v1625_v37  ;;  %v1700_v5 = vld [vmem:[#allocation2 + $0x4] ss:$28 sps:$4 sm:$0xff]   ;;  %v1680_v9 = vld [vmem:[#allocation5 + $0xd4] ss:$8 sps:$4 sm:$0xff]   ;;  %v1593_v10 = vld [vmem:[#allocation5 + $0x250] ss:$8 sps:$4 sm:$0xff]  }
  0x64   :  { %821 = vmatprep.subr.bf16.mxu1 %v1629_v38  ;;  %v1676_v8 = vld [vmem:[#allocation5 + $0xc0] ss:$8 sps:$4 sm:$0xff]   ;;  %843 = vmatprep.mubr.bf16.mxu1 %v1700_v5  ;;  %v1598_v11 = vld [vmem:[#allocation5 + $0x264] ss:$8 sps:$4 sm:$0xff]   ;;  %v1682_v12 = vld [vmem:[#allocation5 + $0xd0] ss:$8 sps:$4 sm:$0xff]  }
  0x65   :  { %867 = vmatpush1.bf16.msra.mxu0 %v1547_v14  ;;  %v1686_v13 = vld [vmem:[#allocation5 + $0xe4] ss:$8 sps:$4 sm:$0xff]   ;;  %v1596_v14 = vld [vmem:[#allocation5 + $0x260] ss:$8 sps:$4 sm:$0xff]   ;;  %v1614_v27 = vld [vmem:[#allocation5 + $0x290] ss:$8 sps:$4 sm:$0xff]  }
  0x66   :  { %868 = vmatprep.subr.bf16.mxu0 %v1548_v15  ;;  %v1604_v15 = vld [vmem:[#allocation5 + $0x274] ss:$8 sps:$4 sm:$0xff]   ;;  %v1610_v20 = vld [vmem:[#allocation5 + $0x284] ss:$8 sps:$4 sm:$0xff]   ;;  %v1608_v23 = vld [vmem:[#allocation5 + $0x280] ss:$8 sps:$4 sm:$0xff]  }
  0x67   :  { %822 = vmatpush1.bf16.msra.mxu1 %v1631_v41  ;;  %v1705_v21 = vld [vmem:[#allocation7 + $0x40] sm:$0xff]   ;;  %v1709_v30 = vld [vmem:[#allocation7 + $0x50] sm:$0xff]   ;;  %v1711_v34 = vld [vmem:[#allocation7 + $0x58] sm:$0xff]   ;;  %vm1859_vm0 = vmmov 0   ;;  %s1860_s13 = smov [#allocation10]  }
  0x68   :  { %823 = vmatprep.subr.bf16.mxu1 %v1635_v42  ;;  %v1706_v24 = vld [vmem:[#allocation7] sm:$0xff]   ;;  %v1628_v33 = vld [vmem:[#allocation5 + $0x2b4] ss:$8 sps:$4 sm:$0xff]   ;;  %s1287_s14 = sshll.u32 %s1860_s13, 4  ;;  %s1288_s14 = int_to_ptr.vmem [resolvable:$true] %s1287_s14 }
  0x69   :  { %869 = vmatpush1.bf16.msra.mxu0 %v1550_v16  ;;  %v1688_v16 = vld [vmem:[#allocation5 + $0xe0] ss:$8 sps:$4 sm:$0xff]   ;;  %v1622_v29 = vld [vmem:[#allocation5 + $0x2a4] ss:$8 sps:$4 sm:$0xff]   ;;  %v1718_v5 = vld [vmem:[#allocation7 + $0x30] sm:$0xff]   ;;  %p1822_p5 = scmp.lt.s32.totalorder %s1288_s14, %s1288_s14 }
  0x6a   :  { %870 = vmatprep.subr.bf16.mxu0 %v1551_v17  ;;  %v1692_v17 = vld [vmem:[#allocation5 + $0xf4] ss:$8 sps:$4 sm:$0xff]   ;;  %v1634_v37 = vld [vmem:[#allocation5 + $0x2c4] ss:$8 sps:$4 sm:$0xff]   ;;  %v1632_v38 = vld [vmem:[#allocation5 + $0x2c0] ss:$8 sps:$4 sm:$0xff]  }
  0x6b   :  { %824 = vmatpush1.bf16.msra.mxu1 %v1637_v45  ;;  %v1646_v41 = vld [vmem:[#allocation5 + $0x2e4] ss:$8 sps:$4 sm:$0xff]   ;;  %v1644_v42 = vld [vmem:[#allocation5 + $0x2e0] ss:$8 sps:$4 sm:$0xff]  }
  0x6c   :  { %825 = vmatprep.subr.bf16.mxu1 %v1641_v46  ;;  %v1661_v45 = vld [vmem:[#allocation5 + $0x304] ss:$8 sps:$4 sm:$0xff]   ;;  %v1656_v46 = vld [vmem:[#allocation2 + $0x10] ss:$28 sps:$4 sm:$0xff]  }
  0x6d   :  { %871 = vmatpush1.bf16.msra.mxu0 %v1553_v18  ;;  %v1602_v18 = vld [vmem:[#allocation5 + $0x270] ss:$8 sps:$4 sm:$0xff]  }
  0x6e   :  { %872 = vmatprep.subr.bf16.mxu0 %v1554_v19  ;;  %v1694_v19 = vld [vmem:[#allocation5 + $0xf0] ss:$8 sps:$4 sm:$0xff]  }
  0x6f   :  { %826 = vmatpush1.bf16.msra.mxu1 %v1643_v49  ;;  %v1665_v49 = vld [vmem:[#allocation5 + $0x310] ss:$8 sps:$4 sm:$0xff]  }
  0x70   :  { %827 = vmatprep.subr.bf16.mxu1 %v1647_v50  ;;  %v1857_v50 = vmov 0  }
  0x71   :  { %873 = vmatpush1.bf16.msra.mxu0 %v1556_v22  ;;  %v1698_v22 = vld [vmem:[#allocation2] ss:$28 sps:$4 sm:$0xff]  }
  0x72   :  { %874 = vmatprep.subr.bf16.mxu0 %v1557_v25  ;;  %v1616_v25 = vld [vmem:[#allocation5 + $0x294] ss:$8 sps:$4 sm:$0xff]  }
  0x73   :  { %828 = vmatpush1.bf16.msra.mxu1 %v1649_v54  ;;  %v1677_v54 = vld [vmem:[#allocation5 + $0x330] ss:$8 sps:$4 sm:$0xff]  }
  0x74   :  { %829 = vmatprep.subr.bf16.mxu1 %v1653_v55  ;;  %v1685_v55 = vld [vmem:[#allocation5 + $0x344] ss:$8 sps:$4 sm:$0xff]  }
  0x75   :  { %875 = vmatpush1.bf16.msra.mxu0 %v1559_v26  ;;  %v1707_v26 = vld [vmem:[#allocation7 + $0x48] sm:$0xff]  }
  0x76   :  { %876 = vmatprep.subr.bf16.mxu0 %v1560_v28  ;;  %v1708_v28 = vld [vmem:[#allocation7 + $0x8] sm:$0xff]  }
  0x77   :  { %830 = vmatpush1.bf16.msra.mxu1 %v1655_v59  ;;  %v1697_v59 = vld [vmem:[#allocation5 + $0x364] ss:$8 sps:$4 sm:$0xff]  }
  0x78   :  { %831 = vmatprep.subr.bf16.mxu1 %v1662_v60  ;;  %v1695_v60 = vld [vmem:[#allocation5 + $0x360] ss:$8 sps:$4 sm:$0xff]  }
  0x79   :  { %877 = vmatpush1.bf16.msra.mxu0 %v1562_v31  ;;  %v1620_v31 = vld [vmem:[#allocation5 + $0x2a0] ss:$8 sps:$4 sm:$0xff]  }
  0x7a   :  { %878 = vmatprep.subr.bf16.mxu0 %v1563_v32  ;;  %v1710_v32 = vld [vmem:[#allocation7 + $0x10] sm:$0xff]  }
  0x7b   :  { %832 = vmatpush1.bf16.msra.mxu1 %v1664_v63  ;;  %v1704_v63 = vld [vmem:[#allocation2 + $0x18] ss:$28 sps:$4 sm:$0xff]  }
  0x7c   :  { %833 = vmatprep.subr.bf16.mxu1 %v1668_v0  ;;  %v1713_v0 = vld [vmem:[#allocation7 + $0x60] sm:$0xff]  }
  0x7d   :  { %879 = vmatpush1.bf16.msra.mxu0 %v1565_v35  ;;  %v1626_v35 = vld [vmem:[#allocation5 + $0x2b0] ss:$8 sps:$4 sm:$0xff]  }
  0x7e   :  { %880 = vmatprep.subr.bf16.mxu0 %v1566_v36  ;;  %v1712_v36 = vld [vmem:[#allocation7 + $0x18] sm:$0xff]  }
  0x7f   :  { %834 = vmatpush1.bf16.msra.mxu1 %v1670_v3  ;;  %v1716_v3 = vld [vmem:[#allocation7 + $0x28] sm:$0xff]  }
  0x80   :  { %835 = vmatprep.subr.bf16.mxu1 %v1674_v4  ;;  %v1717_v4 = vld [vmem:[#allocation7 + $0x70] sm:$0xff]  }
  0x81   :  { %881 = vmatpush1.bf16.msra.mxu0 %v1568_v39  ;;  %v1640_v39 = vld [vmem:[#allocation5 + $0x2d4] ss:$8 sps:$4 sm:$0xff]  }
  0x82   :  { %882 = vmatprep.subr.bf16.mxu0 %v1569_v40  ;;  %v1638_v40 = vld [vmem:[#allocation5 + $0x2d0] ss:$8 sps:$4 sm:$0xff]  }
  0x83   :  { %836 = vmatpush1.bf16.msra.mxu1 %v1676_v8  ;;  %v1858_v8 = vmov 0.0  }
  0x84   :  { %837 = vmatprep.subr.bf16.mxu1 %v1680_v9 }
  0x85   :  { %883 = vmatpush1.bf16.msra.mxu0 %v1571_v43  ;;  %v1652_v43 = vld [vmem:[#allocation5 + $0x2f4] ss:$8 sps:$4 sm:$0xff]  }
  0x86   :  { %884 = vmatprep.subr.bf16.mxu0 %v1572_v44  ;;  %v1650_v44 = vld [vmem:[#allocation5 + $0x2f0] ss:$8 sps:$4 sm:$0xff]  }
  0x87   :  { %838 = vmatpush1.bf16.msra.mxu1 %v1682_v12 }
  0x88   :  { %839 = vmatprep.subr.bf16.mxu1 %v1686_v13  ;;  %v205_v13 = vlaneseq }
  0x89   :  { %885 = vmatpush1.bf16.msra.mxu0 %v1574_v47  ;;  %v1659_v47 = vld [vmem:[#allocation5 + $0x300] ss:$8 sps:$4 sm:$0xff]  }
  0x8a   :  { %897 = vmatprep.subr.bf16.mxu0 %v1580_v48  ;;  %v1667_v48 = vld [vmem:[#allocation5 + $0x314] ss:$8 sps:$4 sm:$0xff]  }
  0x8b   :  { %840 = vmatpush1.bf16.msra.mxu1 %v1688_v16  ;;  %v203_v16 = vld [vmem:[%s1978_s2] sm:$0x3] }
  0x8c   :  { %887 = vmatmul.mubr.bf16.vlgmr.msra.gmra.mrb[0].mxu0 %v1575_v51  ;;  %841 = vmatprep.subr.bf16.mxu1 %v1692_v17  ;;  %v1673_v51 = vld [vmem:[#allocation5 + $0x324] ss:$8 sps:$4 sm:$0xff]  }
  0x8d   :  { %898 = vmatpush1.bf16.msra.mxu0 %v1578_v52  ;;  %929 = vmatprep.mubr.bf16.mxu0 %v1658_v56  ;;  %v1671_v52 = vld [vmem:[#allocation5 + $0x320] ss:$8 sps:$4 sm:$0xff]  }
  0x8e   :  { %899 = vmatprep.subr.bf16.mxu0 %v1583_v53  ;;  %v1679_v53 = vld [vmem:[#allocation5 + $0x334] ss:$8 sps:$4 sm:$0xff]   ;;  %v1683_v56 = vld [vmem:[#allocation5 + $0x340] ss:$8 sps:$4 sm:$0xff]  }
  0x8f   :  { %842 = vmatpush1.bf16.msra.mxu1 %v1694_v19 }
  0x90   :  { %1446 = vmatprep.subr.bf16.mxu1 %v1705_v21 }
  0x91   :  { %900 = vmatpush1.bf16.msra.mxu0 %v1581_v57  ;;  %v1691_v57 = vld [vmem:[#allocation5 + $0x354] ss:$8 sps:$4 sm:$0xff]  }
  0x92   :  { %901 = vmatprep.subr.bf16.mxu0 %v1586_v58  ;;  %844 = vmatmul.mubr.bf16.vlgmr.msra.gmra.mrb[0].mxu1 %v1698_v22  ;;  %v1689_v58 = vld [vmem:[#allocation5 + $0x350] ss:$8 sps:$4 sm:$0xff]  }
  0x93   :  { %1447 = vmatpush3.bf16.msra.mxu1 %v1706_v24 }
  0x94   :  { %1448 = vmatprep.subr.bf16.mxu1 %v1707_v26 }
  0x95   :  { %902 = vmatpush1.bf16.msra.mxu0 %v1584_v61  ;;  %v1703_v61 = vld [vmem:[#allocation5 + $0x374] ss:$8 sps:$4 sm:$0xff]  }
  0x96   :  { %903 = vmatprep.subr.bf16.mxu0 %v1589_v62  ;;  %v1701_v62 = vld [vmem:[#allocation5 + $0x370] ss:$8 sps:$4 sm:$0xff]  }
  0x97   :  { %1449 = vmatpush3.bf16.msra.mxu1 %v1708_v28 }
  0x98   :  { %1450 = vmatprep.subr.bf16.mxu1 %v1709_v30 }
  0x99   :  { %904 = vmatpush1.bf16.msra.mxu0 %v1587_v1  ;;  %v1714_v1 = vld [vmem:[#allocation7 + $0x20] sm:$0xff]  }
  0x9a   :  { %905 = vmatprep.subr.bf16.mxu0 %v1592_v2  ;;  %v1715_v2 = vld [vmem:[#allocation7 + $0x68] sm:$0xff]  }
  0x9b   :  { %1451 = vmatpush3.bf16.msra.mxu1 %v1710_v32 }
  0x9c   :  { %1452 = vmatprep.subr.bf16.mxu1 %v1711_v34 }
  0x9d   :  { %906 = vmatpush1.bf16.msra.mxu0 %v1590_v6  ;;  %v1719_v6 = vld [vmem:[#allocation7 + $0x78] sm:$0xff]  }
  0x9e   :  { %907 = vmatprep.subr.bf16.mxu0 %v1595_v7  ;;  %v1720_v7 = vld [vmem:[#allocation7 + $0x38] sm:$0xff]  }
  0x9f   :  { %1453 = vmatpush3.bf16.msra.mxu1 %v1712_v36 }
  0xa0   :  { %1454 = vmatprep.subr.bf16.mxu1 %v1713_v0 }
  0xa1   :  { %908 = vmatpush1.bf16.msra.mxu0 %v1593_v10 }
  0xa2   :  { %909 = vmatprep.subr.bf16.mxu0 %v1598_v11 }
  0xa3   :  { %1455 = vmatpush3.bf16.msra.mxu1 %v1714_v1 }
  0xa4   :  { %1456 = vmatprep.subr.bf16.mxu1 %v1715_v2 }
  0xa5   :  { %910 = vmatpush1.bf16.msra.mxu0 %v1596_v14  ;;  %v206_v14 = vshrl.u32 %v205_v13, 7 }
  0xa6   :  { %911 = vmatprep.subr.bf16.mxu0 %v1604_v15 }
  0xa7   :  { %1457 = vmatpush3.bf16.msra.mxu1 %v1716_v3  ;;  %v207_v15 = vsub.s32 0, %v206_v14  ;;  %v211_v17 = vsub.s32 1, %v206_v14 }
  0xa8   :  { %1458 = vmatprep.subr.bf16.mxu1 %v1717_v4 }
  0xa9   :  { %912 = vmatpush1.bf16.msra.mxu0 %v1602_v18  ;;  %v208_v18 = vrot.slane %v203_v16, %v207_v15  ;;  %v212_v19 = vrot.slane %v203_v16, %v211_v17 }
  0xaa   :  { %913 = vmatprep.subr.bf16.mxu0 %v1610_v20 }
  0xab   :  { %1459 = vmatpush3.bf16.msra.mxu1 %v1718_v5 }
  0xac   :  { %1460 = vmatprep.subr.bf16.mxu1 %v1719_v6 }
  0xad   :  { %914 = vmatpush1.bf16.msra.mxu0 %v1608_v23 }
  0xae   :  { %915 = vmatprep.subr.bf16.mxu0 %v1616_v25 }
  0xaf   :  { %1461 = vmatpush3.bf16.msra.mxu1 %v1720_v7 }
  0xb0   :  { %1477 = vmatprep.subr.bf16.mxu1 %v1858_v8 }
  0xb1   :  { %916 = vmatpush1.bf16.msra.mxu0 %v1614_v27 }
  0xb2   :  { %917 = vmatprep.subr.bf16.mxu0 %v1622_v29 }
  0xb5   :  { %918 = vmatpush1.bf16.msra.mxu0 %v1620_v31 }
  0xb6   :  { %919 = vmatprep.subr.bf16.mxu0 %v1628_v33 }
  0xb9   :  { %920 = vmatpush1.bf16.msra.mxu0 %v1626_v35 }
  0xba   :  { %921 = vmatprep.subr.bf16.mxu0 %v1634_v37 }
  0xbd   :  { %922 = vmatpush1.bf16.msra.mxu0 %v1632_v38  ;;  %v1721_v38 = vld [vmem:[#allocation8] sm:$0xff]  }
  0xbe   :  { %923 = vmatprep.subr.bf16.mxu0 %v1640_v39  ;;  %v1722_v39 = vld [vmem:[#allocation8 + $0x8] sm:$0xff]  }
  0xc1   :  { %924 = vmatpush1.bf16.msra.mxu0 %v1638_v40  ;;  %v1723_v40 = vld [vmem:[#allocation8 + $0x10] sm:$0xff]  }
  0xc2   :  { %925 = vmatprep.subr.bf16.mxu0 %v1646_v41  ;;  %v1724_v41 = vld [vmem:[#allocation8 + $0x18] sm:$0xff]  }
  0xc5   :  { %926 = vmatpush1.bf16.msra.mxu0 %v1644_v42  ;;  %v1725_v42 = vld [vmem:[#allocation8 + $0x20] sm:$0xff]  }
  0xc6   :  { %927 = vmatprep.subr.bf16.mxu0 %v1652_v43  ;;  %v1726_v43 = vld [vmem:[#allocation8 + $0x28] sm:$0xff]  }
  0xc9   :  { %928 = vmatpush1.bf16.msra.mxu0 %v1650_v44  ;;  %v1727_v44 = vld [vmem:[#allocation8 + $0x30] sm:$0xff]  }
  0xca   :  { %940 = vmatprep.subr.bf16.mxu0 %v1661_v45  ;;  %v1728_v45 = vld [vmem:[#allocation8 + $0x38] sm:$0xff]  }
  0xcc   :  { %930 = vmatmul.mubr.bf16.vlgmr.msra.gmra.mrb[0].mxu0 %v1656_v46 }
  0xcd   :  { %941 = vmatpush1.bf16.msra.mxu0 %v1659_v47  ;;  %972 = vmatprep.mubr.bf16.mxu0 %v1857_v50  ;;  %v1420_v47 = vld [vmem:[%s1980_s4] ss:$0 sm:$0xff]  ;;  %s1817_s4 = scalar_lea.vmem %s1288_s14, 256 }
  0xce   :  { %942 = vmatprep.subr.bf16.mxu0 %v1667_v48  ;;  %p1818_p4 = scmp.ne.s32.totalorder %s1288_s14, %s1817_s4  ;;  %p1823_p6 = scmp.lt.s32.totalorder %s1817_s4, %s1817_s4 }
  0xd0   :  { %p1824_p7 = por %p1823_p6, %p1822_p5 }
  0xd1   :  { %943 = vmatpush1.bf16.msra.mxu0 %v1665_v49 }
  0xd2   :  { %944 = vmatprep.subr.bf16.mxu0 %v1673_v51  ;;  %p1825_p8 = pnand %p1824_p7, %p1818_p4 }
  0xd5   :  { %945 = vmatpush1.bf16.msra.mxu0 %v1671_v52 }
  0xd6   :  { %946 = vmatprep.subr.bf16.mxu0 %v1679_v53 }
  0xd9   :  { %947 = vmatpush1.bf16.msra.mxu0 %v1677_v54 }
  0xda   :  { %948 = vmatprep.subr.bf16.mxu0 %v1685_v55 }
  0xdd   :  { %949 = vmatpush1.bf16.msra.mxu0 %v1683_v56 }
  0xde   :  { %950 = vmatprep.subr.bf16.mxu0 %v1691_v57 }
  0xe1   :  { %951 = vmatpush1.bf16.msra.mxu0 %v1689_v58  ;;  %v1437_v58 = vld [vmem:[%s1982_s6] ss:$0 sm:$0xff] }
  0xe2   :  { %952 = vmatprep.subr.bf16.mxu0 %v1697_v59 }
  0xe5   :  { %953 = vmatpush1.bf16.msra.mxu0 %v1695_v60 }
  0xe6   :  { %954 = vmatprep.subr.bf16.mxu0 %v1703_v61 }
  0xe9   :  { %955 = vmatpush1.bf16.msra.mxu0 %v1701_v62 }
  0xec   :  { %973 = vmatmul.mubr.bf16.vlgmr.msra.gmra.mrb[0].mxu0 %v1704_v63 }
 0x165   :  { %v845_v9 = vpop.f32.mrb[0].mxu1 }
 0x166   :  { %v847_v10 = vpop.f32.mrb[1].mxu1  ;;  %v846_v20 = vadd.f32 %v845_v9, %v208_v18 }
 0x167   :  { %v849_v11 = vpop.f32.mrb[2].mxu1  ;;  %v848_v21 = vadd.f32 %v847_v10, %v212_v19 }
 0x168   :  { %v851_v12 = vpop.f32.mrb[3].mxu1  ;;  %v850_v23 = vadd.f32 %v849_v11, %v208_v18 }
 0x169   :  { %v852_v26 = vadd.f32 %v851_v12, %v212_v19 }
 0x1bf   :  { %v974_v22 = vpop.f32.mrb[0].mxu0 }
 0x1c0   :  { %v1498_v24 = vadd.f32 %v974_v22, %v846_v20  ;;  %v976_v25 = vpop.f32.mrb[1].mxu0 }
 0x1c1   :  { %v1500_v27 = vadd.f32 %v976_v25, %v848_v21  ;;  %v978_v28 = vpop.f32.mrb[2].mxu0 }
 0x1c2   :  { %v1502_v29 = vadd.f32 %v978_v28, %v850_v23  ;;  %v980_v30 = vpop.f32.mrb[3].mxu0  ;;  %v983_v32 = vmax.f32 %v1498_v24, 0.0 }
 0x1c3   :  { %v1504_v31 = vadd.f32 %v980_v30, %v852_v26  ;;  %v984_v34 = vmax.f32 %v1500_v27, 0.0 }
 0x1c4   :  { %v985_v33 = vmax.f32 %v1502_v29, 0.0 }
 0x1c5   :  { %v986_v35 = vmax.f32 %v1504_v31, 0.0 }
 0x1c6   :  { %v987_v36 = vpack.c.bf16 %v985_v33, %v983_v32 }
 0x1c7   :  { %v988_v37 = vpack.c.bf16 %v986_v35, %v984_v34 }
 0x1c9   :  { %1156 = vmatprep.mubr.bf16.mxu1 %v988_v37 }
 0x1ca   :  { %1157 = vmatmul.mubr.bf16.vlgmr.msra.gmra.mrb[4].mxu1 %v987_v36 }
 0x1cb   :  { %1478 = vmatpush3.bf16.msra.mxu1 %v1721_v38  ;;  %1493 = vmatprep.mubr.msk.bf16.mxu1 %vm1859_vm0, %v1858_v8 }
 0x1cc   :  { %1479 = vmatprep.subr.bf16.mxu1 %v1858_v8 }
 0x1cf   :  { %1480 = vmatpush3.bf16.msra.mxu1 %v1722_v39 }
 0x1d0   :  { %1481 = vmatprep.subr.bf16.mxu1 %v1858_v8 }
 0x1d3   :  { %1482 = vmatpush3.bf16.msra.mxu1 %v1723_v40 }
 0x1d4   :  { %1483 = vmatprep.subr.bf16.mxu1 %v1858_v8 }
 0x1d7   :  { %1484 = vmatpush3.bf16.msra.mxu1 %v1724_v41 }
 0x1d8   :  { %1485 = vmatprep.subr.bf16.mxu1 %v1858_v8 }
 0x1db   :  { %1486 = vmatpush3.bf16.msra.mxu1 %v1725_v42 }
 0x1dc   :  { %1487 = vmatprep.subr.bf16.mxu1 %v1858_v8 }
 0x1df   :  { %1488 = vmatpush3.bf16.msra.mxu1 %v1726_v43 }
 0x1e0   :  { %1489 = vmatprep.subr.bf16.mxu1 %v1858_v8 }
 0x1e3   :  { %1490 = vmatpush3.bf16.msra.mxu1 %v1727_v44 }
 0x1e4   :  { %1491 = vmatprep.subr.bf16.mxu1 %v1858_v8 }
 0x1e7   :  { %1492 = vmatpush3.bf16.msra.mxu1 %v1728_v45 }
 0x29d   :  { %v1462_v46 = vpop.f32.mrb[4].mxu1 }
 0x29e   :  { %v1463_v48 = vpop.f32.mrb[5].mxu1 }
 0x29f   :  { %v1464_v49 = vadd.f32 %v1463_v48, %v1462_v46  ;;  %v1465_v50 = vpop.f32.mrb[6].mxu1 }
 0x2a0   :  { %v1466_v51 = vpop.f32.mrb[7].mxu1 }
 0x2a1   :  { %v1159_v52 = vadd.f32 %v1464_v49, %v1420_v47  ;;  %v1467_v53 = vadd.f32 %v1466_v51, %v1465_v50 }
 0x2a3   :  { %v1162_v54 = vadd.f32 %v1467_v53, %v1420_v47  ;;  %v1165_v55 = vmax.f32 %v1159_v52, 0.0 }
 0x2a5   :  { %v1166_v56 = vmax.f32 %v1162_v54, 0.0 }
 0x2a7   :  { %v1167_v57 = vpack.c.bf16 %v1166_v56, %v1165_v55 }
 0x2a9   :  { %1494 = vmatmul.mubr.bf16.vlgmr.msra.gmra.mrb[8].mxu1 %v1167_v57 }
 0x37c   :  { %v1273_v59 = vpop.f32.mrb[8].mxu1 }
 0x37d   :  { %v1274_v60 = vadd.f32 %v1437_v58, %v1273_v59  ;;  %v1495_v61 = vpop.f32.mrb[9].mxu1 }
 0x37e   :  { %v1276_v62 = vpop.f32.mrb[10].mxu1 }
 0x37f   :  { %1280 = vst [vmem:[#allocation10] sm:$0xff] %v1274_v60  ;;  %v1277_v63 = vadd.f32 %v1437_v58, %v1276_v62  ;;  %v1496_v0 = vpop.f32.mrb[11].mxu1 }
 0x381   :  { %1281 = vst [vmem:[#allocation10 + $0x8] sm:$0xff] %v1277_v63 }
 0x382   :  { %1828 = shalt.err (!%p1825_p8)
}
 0x383   :  { %s1829_s17 = scalar_lea.hbm %s1983_s7, 256 }
 0x384   :  { %p1830_p9 = scmp.ne.s32.totalorder %s1983_s7, %s1829_s17  ;;  %p1833_p10 = scmp.lt.u32.totalorder %s1829_s17, %s1983_s7 }
 0x386   :  { %p1835_p11 = pnand %p1833_p10, %p1830_p9 }
 0x388   :  { %1838 = shalt.err (!%p1835_p11)
}
 0x389   :  { %1293 = dma.vmem_to_hbm [thread:$0]  %s1288_s14, 256, %s1983_s7, [#allocation4], %s1848_s11, %s1848_s11, %s1849_s12  }
 0x38a   :  { %1845 = dma.done.wait [#allocation4], 256  }
 0x38b   :  { %1846 = vsyncadd [#allocation4], 4294967040 }
 0x38c   :  { %1297 = vsyncpa [#allocation3], 1 }
 0x38d   :  { %1298 = vsyncpa [#allocation6], 1 }
 0x38e   :  { %1299 = vsyncpa [#allocation9], 1 }
 0x38f   :  { %1300 = vsyncpa [#allocation4], 1 }

</bundles_post_ra>
